<compile_context>
chip_gen: v5e
topology: v5e:2x2
jax: 0.10.0
libtpu: 0.0.40
codegen_flags: <defaults>
</compile_context>

<pallas_src>
import jax
import jax.numpy as jnp
from jax import lax
from jax.experimental import pallas as pl
from jax.experimental.pallas import tpu as pltpu


def _round_up(x, m):
    return ((x + m - 1) // m) * m


def value_function_kernel(s_ref, w1_ref, b1_ref, w2_ref, b2_ref, w3_ref, b3_ref, o_ref):
    x = s_ref[...]  # (TB, S) -- batch on sublanes here, moved to lanes by the dots below.

    # Layer 1: (H, S) . (TB, S)^T -> (H, TB); batch lives on the lane axis.
    h1 = lax.dot_general(
        w1_ref[...], x, (((1,), (1,)), ((), ())),
        preferred_element_type=jnp.float32) + b1_ref[...]
    h1 = jnp.maximum(h1, 0.0)

    # Layer 2: (H, H) @ (H, TB) -> (H, TB)
    h2 = jnp.dot(w2_ref[...], h1, preferred_element_type=jnp.float32) + b2_ref[...]
    h2 = jnp.maximum(h2, 0.0)

    # Output layer: (1, H) @ (H, TB) -> (1, TB); fully lane-dense store.
    out = jnp.dot(w3_ref[...], h2, preferred_element_type=jnp.float32) + b3_ref[...]
    o_ref[...] = out.astype(o_ref.dtype)


def value_function_forward(state, params, *, tile_b=4096, cast_bf16=False):
    """state: (B, state_dim) -> (B,) value estimates.

    params: (w1, b1, w2, b2, w3, b3) with weights shaped (out_dim, in_dim)
    (torch nn.Linear layout) and biases shaped (out_dim, 1).
    """
    w1, b1, w2, b2, w3, b3 = params
    B, S = state.shape
    H = w1.shape[0]

    if cast_bf16:
        # Bandwidth-bound large-B path on v6e/v7x; f32 accumulation is kept
        # inside the kernel via preferred_element_type.
        state = state.astype(jnp.bfloat16)
        w1, w2, w3 = (w.astype(jnp.bfloat16) for w in (w1, w2, w3))

    # Tile size: biggest of tile_b / padded-B; always a multiple of 8 sublanes.
    TB = min(tile_b, _round_up(B, 8))
    Bp = _round_up(B, TB)
    if Bp != B:
        state = jnp.pad(state, ((0, Bp - B), (0, 0)))

    grid = (Bp // TB,)

    def const_spec(shape):
        return pl.BlockSpec(shape, lambda i: tuple(0 for _ in shape))

    param_bytes = sum(a.size * a.dtype.itemsize for a in (w1, b1, w2, b2, w3, b3))
    cost = pl.CostEstimate(
        flops=2 * Bp * (S * H + H * H + H),
        transcendentals=0,
        bytes_accessed=Bp * S * state.dtype.itemsize + Bp * 4 + param_bytes,
    )

    out = pl.pallas_call(
        value_function_kernel,
        out_shape=jax.ShapeDtypeStruct((1, Bp), jnp.float32),
        grid=grid,
        in_specs=[
            pl.BlockSpec((TB, S), lambda i: (i, 0)),          # state: tiled over batch
            const_spec(w1.shape), const_spec(b1.shape),        # params: VMEM-resident
            const_spec(w2.shape), const_spec(b2.shape),
            const_spec(w3.shape), const_spec(b3.shape),
        ],
        out_specs=pl.BlockSpec((1, TB), lambda i: (0, i)),     # lane-dense output row
        compiler_params=pltpu.CompilerParams(
            dimension_semantics=("parallel",)),
        cost_estimate=cost,
    )(state, w1, b1, w2, b2, w3, b3)

    # Squeeze(-1) equivalent + drop batch padding — glue outside the kernel.
    return out[0, :B]


def init_params(key, state_dim, hidden_dim=32, n_hidden=2):
    """Deterministic init mimicking nn.Linear default (uniform +/- 1/sqrt(fan_in)).

    Weights are (out_dim, in_dim) like torch's .weight; biases are (out_dim, 1).
    """
    dims = [state_dim] + [hidden_dim] * n_hidden + [1]
    params = []
    for i in range(len(dims) - 1):
        key, kw, kb = jax.random.split(key, 3)
        fan_in = dims[i]
        bound = 1.0 / (fan_in ** 0.5)
        w = jax.random.uniform(kw, (dims[i + 1], dims[i]), jnp.float32, -bound, bound)
        b = jax.random.uniform(kb, (dims[i + 1], 1), jnp.float32, -bound, bound)
        params.extend([w, b])
    return tuple(params)


def reference_forward(state, params):
    """Plain-JAX reference of the same MLP for a correctness check."""
    w1, b1, w2, b2, w3, b3 = params
    h = jnp.maximum(state @ w1.T + b1[:, 0], 0.0)
    h = jnp.maximum(h @ w2.T + b2[:, 0], 0.0)
    return (h @ w3.T + b3[:, 0])[:, 0]


if __name__ == "__main__":
    key = jax.random.PRNGKey(0)
    batch, state_dim, hidden_dim, n_hidden = 8, 16, 32, 2

    key, ks = jax.random.split(key)
    state = jax.random.normal(ks, (batch, state_dim), jnp.float32)

    params = init_params(key, state_dim, hidden_dim, n_hidden)

    out = value_function_forward(state, params)
    out = jax.block_until_ready(out)

    ref = reference_forward(state, params)
    assert out.shape == (batch,), out.shape
    assert jnp.allclose(out, ref, atol=1e-5, rtol=1e-5), (out, ref)

    # Exercise the batch-padding path (B not a multiple of the sublane tile).
    key, ks2 = jax.random.split(key)
    state2 = jax.random.normal(ks2, (13, state_dim), jnp.float32)
    out2 = jax.block_until_ready(value_function_forward(state2, params))
    ref2 = reference_forward(state2, params)
    assert out2.shape == (13,), out2.shape
    assert jnp.allclose(out2, ref2, atol=1e-5, rtol=1e-5), (out2, ref2)

    print("KERNEL_OK")
</pallas_src>

<mosaic_0001>
module attributes {stable_mosaic.version = 11 : i64} {
  func.func @value_function_kernel(%arg0: i32, %arg1: memref<8x16xf32, #tpu.memory_space<vmem>>, %arg2: memref<32x16xf32, #tpu.memory_space<vmem>>, %arg3: memref<32x1xf32, #tpu.memory_space<vmem>>, %arg4: memref<32x32xf32, #tpu.memory_space<vmem>>, %arg5: memref<32x1xf32, #tpu.memory_space<vmem>>, %arg6: memref<1x32xf32, #tpu.memory_space<vmem>>, %arg7: memref<1x1xf32, #tpu.memory_space<vmem>>, %arg8: memref<1x8xf32, #tpu.memory_space<vmem>>) attributes {dimension_semantics = [#tpu.dimension_semantics<parallel>], iteration_bounds = array<i64: 1>, scalar_prefetch = 0 : i64, scratch_operands = 0 : i64, tpu.core_type = #tpu.core_type<tc>, window_params = [{transform_indices = @transform_0, window_bounds = array<i64: 8, 16>}, {pipeline_mode = #tpu.pipeline_mode<synchronous>, transform_indices = @transform_1, window_bounds = array<i64: 32, 16>}, {pipeline_mode = #tpu.pipeline_mode<synchronous>, transform_indices = @transform_2, window_bounds = array<i64: 32, 1>}, {pipeline_mode = #tpu.pipeline_mode<synchronous>, transform_indices = @transform_3, window_bounds = array<i64: 32, 32>}, {pipeline_mode = #tpu.pipeline_mode<synchronous>, transform_indices = @transform_4, window_bounds = array<i64: 32, 1>}, {pipeline_mode = #tpu.pipeline_mode<synchronous>, transform_indices = @transform_5, window_bounds = array<i64: 1, 32>}, {pipeline_mode = #tpu.pipeline_mode<synchronous>, transform_indices = @transform_6, window_bounds = array<i64: 1, 1>}, {transform_indices = @transform_7, window_bounds = array<i64: 1, 8>}]} {
    %c0 = arith.constant 0 : index
    %c0_0 = arith.constant 0 : index
    %0 = vector.load %arg1[%c0, %c0_0] : memref<8x16xf32, #tpu.memory_space<vmem>>, vector<8x16xf32>
    %c0_1 = arith.constant 0 : index
    %c0_2 = arith.constant 0 : index
    %1 = vector.load %arg2[%c0_1, %c0_2] : memref<32x16xf32, #tpu.memory_space<vmem>>, vector<32x16xf32>
    %cst = arith.constant dense<0.000000e+00> : vector<32x8xf32>
    %2 = tpu.matmul %1, %0, %cst {dimension_numbers = #tpu.dot_dimension_numbers<[1], [1], [0], [0], [0, 0, 1, 0], [], []>} : vector<32x16xf32>, vector<8x16xf32>, vector<32x8xf32> -> vector<32x8xf32>
    %c0_3 = arith.constant 0 : index
    %c0_4 = arith.constant 0 : index
    %3 = vector.load %arg3[%c0_3, %c0_4] : memref<32x1xf32, #tpu.memory_space<vmem>>, vector<32x1xf32>
    %4 = vector.broadcast %3 : vector<32x1xf32> to vector<32x8xf32>
    %5 = arith.addf %2, %4 : vector<32x8xf32>
    %cst_5 = arith.constant 0.000000e+00 : f32
    %6 = vector.broadcast %cst_5 : f32 to vector<32x8xf32>
    %7 = arith.maximumf %5, %6 : vector<32x8xf32>
    %c0_6 = arith.constant 0 : index
    %c0_7 = arith.constant 0 : index
    %8 = vector.load %arg4[%c0_6, %c0_7] : memref<32x32xf32, #tpu.memory_space<vmem>>, vector<32x32xf32>
    %cst_8 = arith.constant dense<0.000000e+00> : vector<32x8xf32>
    %9 = tpu.matmul %8, %7, %cst_8 {dimension_numbers = #tpu.dot_dimension_numbers<[1], [0], [0], [1], [0, 0, 1, 1], [], []>} : vector<32x32xf32>, vector<32x8xf32>, vector<32x8xf32> -> vector<32x8xf32>
    %c0_9 = arith.constant 0 : index
    %c0_10 = arith.constant 0 : index
    %10 = vector.load %arg5[%c0_9, %c0_10] : memref<32x1xf32, #tpu.memory_space<vmem>>, vector<32x1xf32>
    %11 = vector.broadcast %10 : vector<32x1xf32> to vector<32x8xf32>
    %12 = arith.addf %9, %11 : vector<32x8xf32>
    %cst_11 = arith.constant 0.000000e+00 : f32
    %13 = vector.broadcast %cst_11 : f32 to vector<32x8xf32>
    %14 = arith.maximumf %12, %13 : vector<32x8xf32>
    %c0_12 = arith.constant 0 : index
    %c0_13 = arith.constant 0 : index
    %15 = vector.load %arg6[%c0_12, %c0_13] : memref<1x32xf32, #tpu.memory_space<vmem>>, vector<1x32xf32>
    %cst_14 = arith.constant dense<0.000000e+00> : vector<1x8xf32>
    %16 = tpu.matmul %15, %14, %cst_14 {dimension_numbers = #tpu.dot_dimension_numbers<[1], [0], [0], [1], [0, 0, 1, 1], [], []>} : vector<1x32xf32>, vector<32x8xf32>, vector<1x8xf32> -> vector<1x8xf32>
    %c0_15 = arith.constant 0 : index
    %c0_16 = arith.constant 0 : index
    %17 = vector.load %arg7[%c0_15, %c0_16] : memref<1x1xf32, #tpu.memory_space<vmem>>, vector<1x1xf32>
    %18 = vector.broadcast %17 : vector<1x1xf32> to vector<1x8xf32>
    %19 = arith.addf %16, %18 : vector<1x8xf32>
    %c0_17 = arith.constant 0 : index
    %c0_18 = arith.constant 0 : index
    %20 = vector.load %arg8[%c0_17, %c0_18] : memref<1x8xf32, #tpu.memory_space<vmem>>, vector<1x8xf32>
    tpu.vector_store %arg8[%c0_17, %c0_18], %19 {strides = array<i32>} : memref<1x8xf32, #tpu.memory_space<vmem>>, vector<1x8xf32>,
    return
  }
  func.func @transform_0(%arg0: i32) -> (i32, i32) {
    %c0_i32 = arith.constant 0 : i32
    %c0_i32_0 = arith.constant 0 : i32
    return %arg0, %c0_i32 : i32, i32
  }
  func.func @transform_1(%arg0: i32) -> (i32, i32) {
    %c0_i32 = arith.constant 0 : i32
    %c0_i32_0 = arith.constant 0 : i32
    %c0_i32_1 = arith.constant 0 : i32
    return %c0_i32, %c0_i32_0 : i32, i32
  }
  func.func @transform_2(%arg0: i32) -> (i32, i32) {
    %c0_i32 = arith.constant 0 : i32
    %c0_i32_0 = arith.constant 0 : i32
    %c0_i32_1 = arith.constant 0 : i32
    return %c0_i32, %c0_i32_0 : i32, i32
  }
  func.func @transform_3(%arg0: i32) -> (i32, i32) {
    %c0_i32 = arith.constant 0 : i32
    %c0_i32_0 = arith.constant 0 : i32
    %c0_i32_1 = arith.constant 0 : i32
    return %c0_i32, %c0_i32_0 : i32, i32
  }
  func.func @transform_4(%arg0: i32) -> (i32, i32) {
    %c0_i32 = arith.constant 0 : i32
    %c0_i32_0 = arith.constant 0 : i32
    %c0_i32_1 = arith.constant 0 : i32
    return %c0_i32, %c0_i32_0 : i32, i32
  }
  func.func @transform_5(%arg0: i32) -> (i32, i32) {
    %c0_i32 = arith.constant 0 : i32
    %c0_i32_0 = arith.constant 0 : i32
    %c0_i32_1 = arith.constant 0 : i32
    return %c0_i32, %c0_i32_0 : i32, i32
  }
  func.func @transform_6(%arg0: i32) -> (i32, i32) {
    %c0_i32 = arith.constant 0 : i32
    %c0_i32_0 = arith.constant 0 : i32
    %c0_i32_1 = arith.constant 0 : i32
    return %c0_i32, %c0_i32_0 : i32, i32
  }
  func.func @transform_7(%arg0: i32) -> (i32, i32) {
    %c0_i32 = arith.constant 0 : i32
    %c0_i32_0 = arith.constant 0 : i32
    return %c0_i32, %arg0 : i32, i32
  }
}

</mosaic_0001>

<bundles_post_ra>
// kernel: tpu_custom_call.1
= control target key start
LH: loop header
LB: loop body
LE: loop exit
PB: predicated region body
PF: predicated region fallthrough
CT: control target
= control target key end

     0   :  { %s393_s0 = inlined_call_operand.vmem [shape: f32[8,16], index: 0, kind: input, shape index: {}]   ;;  %s394_s1 = inlined_call_operand.vmem [shape: f32[32,16], index: 1, kind: input, shape index: {}]   ;;  %s395_s2 = inlined_call_operand.vmem [shape: f32[32,1], index: 2, kind: input, shape index: {}]   ;;  %s396_s3 = inlined_call_operand.vmem [shape: f32[32,32], index: 3, kind: input, shape index: {}]   ;;  %s397_s4 = inlined_call_operand.vmem [shape: f32[32,1], index: 4, kind: input, shape index: {}]   ;;  %s398_s5 = inlined_call_operand.vmem [shape: f32[1,32], index: 5, kind: input, shape index: {}]   ;;  %s399_s6 = inlined_call_operand.<no memory space> [shape: f32[1,1], index: 6, kind: input, shape index: {}]   ;;  %s400_s7 = inlined_call_operand.hbm [shape: f32[1,8], index: 7, kind: output, shape index: {}]  }
   0x1   :  { %v12_v0 = vstv %s399_s6 }
   0x2   :  { %13 = vst [vmem:[#allocation2] sm:$0x1] %v12_v0 }
   0x3   :  { %v29_v1 = vld [vmem:[%s393_s0] sm:$0xff]  ;;  %vm58_vm0 = vcmask 130048   ;;  %v37_v2 = vld [vmem:[%s395_s2 + $0x18] sm:$0xff]  ;;  %v280_v4 = vmov 0   ;;  %v35_v5 = vld [vmem:[%s395_s2 + $0x8] sm:$0xff] }
   0x4   :  { %230 = vmatpush.xpose.msk.msra.mxu0 %vm58_vm0, %v29_v1  ;;  %v30_v3 = vld [vmem:[%s394_s1] sm:$0xff]  ;;  %252 = vset.pattern.permute.xlu1 %v280_v4  ;;  %v33_v6 = vld [vmem:[%s394_s1 + $0x18] sm:$0xff] }
   0x5   :  { %251 = vset.pattern.permute.xlu0 %v280_v4  ;;  %45 = vperm.xlu1 %252, %v35_v5  }
   0x6   :  { %55 = vperm.xlu0 %251, %v37_v2   ;;  %240 = vmatpush.xpose.msk.msra.mxu1 %vm58_vm0, %v29_v1 }
   0x7   :  { %14 = vsyncpa [#allocation4], 0  ;;  %231 = vmatmul.msk.f32.vlgmr.msra.gmra.mxu0 %vm58_vm0, %v30_v3  ;;  %253 = vset.pattern.permute.xlu2 %v280_v4  ;;  %v34_v7 = vld [vmem:[%s395_s2] sm:$0xff]  ;;  %v36_v8 = vld [vmem:[%s395_s2 + $0x10] sm:$0xff]  ;;  %vm135_vm1 = vcmask 261120   ;;  %s281_s6 = smov [#allocation3]  }
   0x8   :  { %v31_v9 = vld [vmem:[%s394_s1 + $0x8] sm:$0xff]  ;;  %v111_v10 = vld [vmem:[%s397_s4] sm:$0xff]  ;;  %v32_v12 = vld [vmem:[%s394_s1 + $0x10] sm:$0xff]  ;;  %s219_s0 = sshll.u32 %s281_s6, 4  ;;  %s221_s12 = sshll.u32 %s400_s7, 4  ;;  %vm212_vm2 = vcmask 57344   ;;  %s220_s0 = int_to_ptr.vmem [resolvable:$true] %s219_s0  ;;  %s222_s12 = int_to_ptr.hbm [resolvable:$true] %s221_s12 }
   0x9   :  { %234 = vmatmul.msk.f32.vlgmr.msra.gmra.mxu1 %vm58_vm0, %v33_v6  ;;  %v112_v11 = vld [vmem:[%s397_s4 + $0x8] sm:$0xff]  ;;  %v114_v17 = vld [vmem:[%s397_s4 + $0x18] sm:$0xff]  ;;  %v113_v21 = vld [vmem:[%s397_s4 + $0x10] sm:$0xff] }
   0xa   :  { %132 = vperm.xlu2 %253, %v114_v17   ;;  %v182_v27 = vld [vmem:[#allocation2] sm:$0x1]  ;;  %v108_v33 = vld [vmem:[%s396_s3 + $0x8] sm:$0xff]  ;;  %v109_v34 = vld [vmem:[%s396_s3 + $0x10] sm:$0xff] }
   0xb   :  { %v107_v32 = vld [vmem:[%s396_s3] sm:$0xff]  ;;  %v110_v35 = vld [vmem:[%s396_s3 + $0x18] sm:$0xff] }
   0xc   :  { %v181_v52 = vld [vmem:[%s398_s5] sm:$0x1] }
   0xd   :  { %40 = vperm.xlu1 %252, %v34_v7  }
   0xe   :  { %50 = vperm.xlu0 %251, %v36_v8  }
   0xf   :  { %232 = vmatmul.msk.f32.gmra.mxu0 %vm58_vm0, %v31_v9 }
  0x12   :  { %127 = vperm.xlu2 %253, %v113_v21  }
  0x15   :  { %117 = vperm.xlu1 %252, %v111_v10  }
  0x16   :  { %122 = vperm.xlu0 %251, %v112_v11  }
  0x17   :  { %233 = vmatmul.msk.f32.gmra.mxu0 %vm58_vm0, %v32_v12 }
  0x1a   :  { %185 = vperm.xlu2 %253, %v182_v27  }
  0x64   :  { %v133_v36 = vpop.permute.xlu2 %132 }
  0x6c   :  { %v128_v38 = vpop.permute.xlu2 %127 }
  0x74   :  { %v186_v53 = vpop.permute.xlu2 %185 }
  0x75   :  { %v188_v54 = vperm.slane %v186_v53, 0 }
  0x77   :  { %v46_v18 = vpop.permute.xlu1 %45 }
  0x78   :  { %v56_v14 = vpop.permute.xlu0 %55 }
  0x7f   :  { %v41_v22 = vpop.permute.xlu1 %40 }
  0x80   :  { %v51_v23 = vpop.permute.xlu0 %50 }
  0x84   :  { %v91_v13 = vpop.f32.mrf.mxu0 }
  0x85   :  { %v92_v28 = vadd.f32 %v91_v13, %v41_v22 }
  0x86   :  { %v100_v15 = vpop.f32.mrf.mxu1 }
  0x87   :  { %v101_v16 = vadd.f32 %v100_v15, %v56_v14  ;;  %v103_v31 = vmax.f32 %v92_v28, 0.0  ;;  %v118_v47 = vpop.permute.xlu1 %117 }
  0x88   :  { %v123_v43 = vpop.permute.xlu0 %122 }
  0x89   :  { %v106_v19 = vmax.f32 %v101_v16, 0.0 }
  0x8b   :  { %160 = vmatpush.msrb.mxu1 %v106_v19  ;;  %241 = vmatpush.msra.mxu2 %v106_v19 }
  0x8c   :  { %v94_v20 = vpop.f32.mrf.mxu0  ;;  %242 = vmatpush.msra.mxu3 %v106_v19 }
  0x8d   :  { %v95_v25 = vadd.f32 %v94_v20, %v46_v18 }
  0x8f   :  { %v104_v30 = vmax.f32 %v95_v25, 0.0 }
  0x94   :  { %v97_v24 = vpop.f32.mrf.mxu0 }
  0x95   :  { %v98_v26 = vadd.f32 %v97_v24, %v51_v23 }
  0x97   :  { %v105_v29 = vmax.f32 %v98_v26, 0.0 }
  0x99   :  { %161 = vmatpush.msrb.mxu1 %v105_v29  ;;  %243 = vmatpush.msra.mxu2 %v105_v29 }
  0x9a   :  { %244 = vmatpush.msra.mxu3 %v105_v29 }
  0x9b   :  { %162 = vmatpush.msrb.mxu1 %v104_v30  ;;  %245 = vmatpush.msra.mxu2 %v104_v30 }
  0x9c   :  { %246 = vmatpush.msra.mxu3 %v104_v30 }
  0x9d   :  { %163 = vmatpush.msrb.mxu1 %v103_v31  ;;  %247 = vmatpush.msra.mxu2 %v103_v31 }
  0x9e   :  { %248 = vmatpush.msra.mxu3 %v103_v31  ;;  %235 = vmatmul.msk.f32.vlgmr.msrb.gmra.mxu1 %vm135_vm1, %v107_v32 }
  0x9f   :  { %236 = vmatmul.msk.f32.vlgmr.msra.gmra.mxu2 %vm135_vm1, %v108_v33  ;;  %237 = vmatmul.msk.f32.vlgmr.msra.gmra.mxu3 %vm135_vm1, %v109_v34 }
  0xa7   :  { %238 = vmatmul.msk.f32.gmra.mxu3 %vm135_vm1, %v110_v35 }
 0x11b   :  { %v165_v44 = vpop.f32.mrf.mxu1 }
 0x11c   :  { %v166_v48 = vadd.f32 %v165_v44, %v118_v47 }
 0x11e   :  { %v177_v51 = vmax.f32 %v166_v48, 0.0 }
 0x122   :  { %v171_v37 = vpop.f32.mrf.mxu3  ;;  %v168_v39 = vpop.f32.mrf.mxu2 }
 0x123   :  { %v172_v41 = vadd.f32 %v171_v37, %v128_v38  ;;  %v169_v45 = vadd.f32 %v168_v39, %v123_v43 }
 0x125   :  { %v179_v49 = vmax.f32 %v172_v41, 0.0  ;;  %v178_v50 = vmax.f32 %v169_v45, 0.0 }
 0x12a   :  { %v174_v40 = vpop.f32.mrf.mxu3 }
 0x12b   :  { %v175_v42 = vadd.f32 %v174_v40, %v133_v36 }
 0x12d   :  { %v180_v46 = vmax.f32 %v175_v42, 0.0 }
 0x12f   :  { %204 = vmatpush.msrb.mxu2 %v180_v46 }
 0x131   :  { %205 = vmatpush.msrb.mxu2 %v179_v49 }
 0x133   :  { %206 = vmatpush.msrb.mxu2 %v178_v50 }
 0x135   :  { %207 = vmatpush.msrb.mxu2 %v177_v51 }
 0x136   :  { %239 = vmatmul.msk.f32.vlgmr.msrb.gmra.mxu2 %vm135_vm1, %v181_v52 }
 0x1b9   :  { %v209_v55 = vpop.f32.mrf.mxu2 }
 0x1ba   :  { %v210_v56 = vadd.f32 %v209_v55, %v188_v54 }
 0x1bc   :  { %213 = vst.msk [vmem:[#allocation3] sm:$0x1] %vm212_vm2, %v210_v56 }
 0x1bd   :  { %224 = dma.vmem_to_hbm [thread:$0]  %s220_s0, 16, %s222_s12, [#allocation4]  }
 0x1be   :  { %278 = dma.done.wait [#allocation4], 16  }
 0x1bf   :  { %279 = vsyncadd [#allocation4], 4294967280 }
 0x1c0   :  { %229 = vsyncpa [#allocation4], 1 }

</bundles_post_ra>
